<compile_context>
chip_gen: v5e
topology: v5e:2x2
jax: 0.10.0
libtpu: 0.0.40
codegen_flags: <defaults>
</compile_context>

<pallas_src>
import math
import functools

import jax
import jax.numpy as jnp
from jax.experimental import pallas as pl
from jax.experimental.pallas import tpu as pltpu


def _round_up(v, m):
    return ((v + m - 1) // m) * m


def _arcface_kernel(label_ref, x_ref, w_ref, out_ref, inv_ref, *,
                    tn, s, cos_m, sin_m, th, mm):
    # grid = (Cp // tn, Bp // tm): axis 0 = class blocks (j, parallel),
    # axis 1 = batch blocks (i, arbitrary / innermost).
    j = pl.program_id(0)
    i = pl.program_id(1)

    # ---- per-class inverse L2 norm, hoisted to once per class block ----------
    # w_ref is the pre-transposed (E, tn) weight tile; it stays resident across
    # the whole i sweep, so compute its column norms only at i == 0.
    @pl.when(i == 0)
    def _():
        wf = w_ref[...].astype(jnp.float32)                       # (E, tn)
        ssq = jnp.sum(wf * wf, axis=0, keepdims=True)             # (1, tn) sublane reduce
        # rsqrt(max(ssq, eps^2)) == 1 / max(||w||, 1e-12)  (matches F.normalize)
        inv_ref[...] = jax.lax.rsqrt(jnp.maximum(ssq, 1e-24))

    # ---- cosine = x @ normalize(W)^T : raw NN matmul, norm applied in f32 ----
    raw = jnp.dot(x_ref[...], w_ref[...],
                  preferred_element_type=jnp.float32)             # (tm, tn) f32
    cosine = raw * inv_ref[...]                                   # broadcast (1, tn)

    # ---- one-hot mask from a (1, tn) iota vs the (tm, 1) label column --------
    col = jax.lax.broadcasted_iota(jnp.int32, (1, tn), 1) + j * tn
    one_hot = col == label_ref[...]                               # (tm, tn) bool

    # ---- ArcFace margin on the target column only ----------------------------
    # phi is consumed at exactly one element per row, so do the margin math on
    # the (tm, 1) target cosine instead of the full tile.
    tgt = jnp.sum(jnp.where(one_hot, cosine, 0.0),
                  axis=1, keepdims=True)                          # (tm, 1)
    sine = jnp.sqrt(jnp.clip(1.0 - tgt * tgt, 0.0, 1.0))
    phi = tgt * cos_m - sine * sin_m
    phi = jnp.where(tgt > th, phi, tgt - mm)                      # (tm, 1)

    out_ref[...] = (jnp.where(one_hot, phi, cosine) * s).astype(out_ref.dtype)


def arcface_head(x, weight, label, *, s=64.0, m=0.5,
                 tm=None, tn=None, use_bf16=False, out_dtype=jnp.float32):
    """ArcFace head forward (matches Arcface_Head.forward).

    x:      (B, E) float  embeddings
    weight: (C, E) float  class weights
    label:  (B,)   int    ground-truth class ids
    returns (B, C) `out_dtype` margin logits scaled by s
    """
    B, E = x.shape
    C, E2 = weight.shape
    assert E == E2

    out_dtype = jnp.dtype(out_dtype)
    # bf16 operands / outputs pack 16 rows per sublane group.
    sub = 16 if (use_bf16 or out_dtype.itemsize < 4) else 8

    # ---- tile selection: large, lane-dense tiles; >= 2 class blocks ----------
    if tm is None:
        tm = min(512, _round_up(B, sub))
    else:
        tm = _round_up(tm, sub)
    if tn is None:
        tn_cap = 2048 if E <= 1024 else 1024
        tn = min(tn_cap, _round_up(C, 128))
    else:
        tn = _round_up(tn, 128)
    # Ensure at least 2 class blocks (megacore balance on v7x) when C allows.
    while tn > 128 and _round_up(C, tn) // tn < 2:
        tn = max(128, _round_up(tn // 2, 128))

    Bp = _round_up(B, tm)
    Cp = _round_up(C, tn)

    compute_dtype = jnp.bfloat16 if use_bf16 else jnp.float32
    xk = x.astype(compute_dtype)
    # Pre-transposed weight (E, C): plain NN MXU contraction inside the kernel
    # and native (1, tn) sublane-reduce norms (no per-step weight transpose).
    wT = weight.astype(compute_dtype).T
    lab = label.astype(jnp.int32)

    if Bp != B:
        xk = jnp.pad(xk, ((0, Bp - B), (0, 0)))
        lab = jnp.pad(lab, ((0, Bp - B),))
    if Cp != C:
        wT = jnp.pad(wT, ((0, 0), (0, Cp - C)))   # zero cols -> cosine 0 (sliced off)
    lab2d = lab.reshape(Bp, 1)

    cos_m = math.cos(m)
    sin_m = math.sin(m)
    th = math.cos(math.pi - m)
    mm = math.sin(math.pi - m) * m

    kernel = functools.partial(_arcface_kernel, tn=tn, s=float(s),
                               cos_m=cos_m, sin_m=sin_m, th=th, mm=mm)

    in_bytes = 2 if use_bf16 else 4
    out_bytes = out_dtype.itemsize
    # double-buffered tile footprint estimate (+ labels + inv-norm scratch)
    vmem_est = (2 * tm * E * in_bytes          # x tiles
                + 2 * E * tn * in_bytes        # weight tiles
                + 2 * tm * tn * out_bytes      # output tiles
                + 2 * tm * 128 * 4             # labels (lane-padded)
                + 8 * tn * 4)                  # inv-norm scratch
    # Cap at 48 MiB: v7x has only 64 MiB VMEM per TensorCore.
    vmem_limit = int(min(max(32 * 1024 * 1024, 2 * vmem_est), 48 * 1024 * 1024))

    n_j = Cp // tn
    n_i = Bp // tm
    cost = pl.CostEstimate(
        flops=2 * Bp * Cp * E + 6 * Bp * Cp,
        transcendentals=Bp * n_j + Cp,                     # target-col sqrt + rsqrt
        bytes_accessed=(E * Cp * in_bytes                  # one pass over W
                        + n_j * Bp * E * in_bytes          # x per class block
                        + n_j * Bp * 4                     # labels per class block
                        + Bp * Cp * out_bytes))            # output writeback

    out = pl.pallas_call(
        kernel,
        out_shape=jax.ShapeDtypeStruct((Bp, Cp), out_dtype),
        grid_spec=pltpu.PrefetchScalarGridSpec(
            num_scalar_prefetch=0,
            # class blocks outermost (parallel / megacore-sharded); the weight
            # tile and its inv-norm scratch stay resident across the inner
            # batch sweep (batch axis "arbitrary" because of the scratch carry).
            grid=(n_j, n_i),
            in_specs=[
                pl.BlockSpec((tm, 1), lambda j, i: (i, 0)),    # labels
                pl.BlockSpec((tm, E), lambda j, i: (i, 0)),    # x (full E, no k axis)
                pl.BlockSpec((E, tn), lambda j, i: (0, j)),    # W^T columns
            ],
            out_specs=pl.BlockSpec((tm, tn), lambda j, i: (i, j)),
            scratch_shapes=[pltpu.VMEM((1, tn), jnp.float32)], # per-class inv norms
        ),
        compiler_params=pltpu.CompilerParams(
            dimension_semantics=("parallel", "arbitrary"),
            vmem_limit_bytes=vmem_limit),
        cost_estimate=cost,
    )(lab2d, xk, wT)

    if Bp != B or Cp != C:
        out = out[:B, :C]
    return out


def _reference(x, weight, label, s=64.0, m=0.5):
    cos_m, sin_m = math.cos(m), math.sin(m)
    th, mm = math.cos(math.pi - m), math.sin(math.pi - m) * m
    w_n = weight / jnp.maximum(
        jnp.linalg.norm(weight, axis=1, keepdims=True), 1e-12)
    cosine = x @ w_n.T
    sine = jnp.sqrt(jnp.clip(1.0 - cosine ** 2, 0.0, 1.0))
    phi = cosine * cos_m - sine * sin_m
    phi = jnp.where(cosine > th, phi, cosine - mm)
    one_hot = jax.nn.one_hot(label, weight.shape[0], dtype=x.dtype)
    return (one_hot * phi + (1.0 - one_hot) * cosine) * s


if __name__ == "__main__":
    # Small shapes consistent with Arcface_Head (mobilefacenet embedding = 128).
    # Non-multiple B / C exercise the padding path.
    B, E, C = 20, 128, 1000
    s_param, m_param = 64.0, 0.5

    key = jax.random.PRNGKey(0)
    kx, kw, kl = jax.random.split(key, 3)

    bound = math.sqrt(6.0 / (C + E))                 # xavier_uniform_
    weight = jax.random.uniform(kw, (C, E), jnp.float32, -bound, bound)
    x = jax.random.normal(kx, (B, E), jnp.float32)
    label = jax.random.randint(kl, (B,), 0, C, jnp.int32)

    # f32 path: exact-tolerance check against the reference.
    out = arcface_head(x, weight, label, s=s_param, m=m_param)
    out = jax.block_until_ready(out)
    ref = _reference(x, weight, label, s=s_param, m=m_param)
    assert out.shape == (B, C)
    assert jnp.allclose(out, ref, atol=5e-3, rtol=1e-3), float(
        jnp.max(jnp.abs(out - ref)))

    # bf16-operand / bf16-output path (halved HBM traffic): sanity check only.
    out_bf = arcface_head(x, weight, label, s=s_param, m=m_param,
                          use_bf16=True, out_dtype=jnp.bfloat16)
    out_bf = jax.block_until_ready(out_bf)
    assert out_bf.shape == (B, C)
    assert bool(jnp.all(jnp.isfinite(out_bf.astype(jnp.float32))))

    print("KERNEL_OK")
</pallas_src>

<mosaic_0001>
module attributes {stable_mosaic.version = 11 : i64} {
  func.func @_arcface_kernel(%arg0: i32, %arg1: i32, %arg2: memref<24x1xi32, #tpu.memory_space<vmem>>, %arg3: memref<24x128xf32, #tpu.memory_space<vmem>>, %arg4: memref<128x512xf32, #tpu.memory_space<vmem>>, %arg5: memref<24x512xf32, #tpu.memory_space<vmem>>, %arg6: memref<1x512xf32, #tpu.memory_space<vmem>>) attributes {dimension_semantics = [#tpu.dimension_semantics<parallel>, #tpu.dimension_semantics<arbitrary>], iteration_bounds = array<i64: 2, 1>, scalar_prefetch = 0 : i64, scratch_operands = 1 : i64, tpu.core_type = #tpu.core_type<tc>, window_params = [{transform_indices = @transform_0, window_bounds = array<i64: 24, 1>}, {transform_indices = @transform_1, window_bounds = array<i64: 24, 128>}, {transform_indices = @transform_2, window_bounds = array<i64: 128, 512>}, {transform_indices = @transform_3, window_bounds = array<i64: 24, 512>}]} {
    %c0_i32 = arith.constant 0 : i32
    %0 = arith.cmpi eq, %arg1, %c0_i32 : i32
    %1 = arith.extui %0 : i1 to i32
    %c0_i32_0 = arith.constant 0 : i32
    %2 = arith.cmpi ne, %1, %c0_i32_0 : i32
    scf.if %2 {
      %c0_20 = arith.constant 0 : index
      %c0_21 = arith.constant 0 : index
      %45 = vector.load %arg4[%c0_20, %c0_21] : memref<128x512xf32, #tpu.memory_space<vmem>>, vector<128x512xf32>
      %46 = arith.mulf %45, %45 : vector<128x512xf32>
      %cst_22 = arith.constant dense<0.000000e+00> : vector<512xf32>
      %47 = vector.multi_reduction <add>, %46, %cst_22 [0] : vector<128x512xf32> to vector<512xf32>
      %48 = vector.shape_cast %47 : vector<512xf32> to vector<1x512xf32>
      %cst_23 = arith.constant 1.000000e-24 : f32
      %49 = vector.broadcast %cst_23 : f32 to vector<1x512xf32>
      %50 = arith.maximumf %48, %49 : vector<1x512xf32>
      %51 = math.rsqrt %50 : vector<1x512xf32>
      %c0_24 = arith.constant 0 : index
      %c0_25 = arith.constant 0 : index
      %52 = vector.load %arg6[%c0_24, %c0_25] : memref<1x512xf32, #tpu.memory_space<vmem>>, vector<1x512xf32>
      tpu.vector_store %arg6[%c0_24, %c0_25], %51 {strides = array<i32>} : memref<1x512xf32, #tpu.memory_space<vmem>>, vector<1x512xf32>,
    } else {
    }
    %c0 = arith.constant 0 : index
    %c0_1 = arith.constant 0 : index
    %3 = vector.load %arg3[%c0, %c0_1] : memref<24x128xf32, #tpu.memory_space<vmem>>, vector<24x128xf32>
    %c0_2 = arith.constant 0 : index
    %c0_3 = arith.constant 0 : index
    %4 = vector.load %arg4[%c0_2, %c0_3] : memref<128x512xf32, #tpu.memory_space<vmem>>, vector<128x512xf32>
    %cst = arith.constant dense<0.000000e+00> : vector<24x512xf32>
    %5 = tpu.matmul %3, %4, %cst {dimension_numbers = #tpu.dot_dimension_numbers<[1], [0], [0], [1], [0, 0, 1, 1], [], []>} : vector<24x128xf32>, vector<128x512xf32>, vector<24x512xf32> -> vector<24x512xf32>
    %c0_4 = arith.constant 0 : index
    %c0_5 = arith.constant 0 : index
    %6 = vector.load %arg6[%c0_4, %c0_5] : memref<1x512xf32, #tpu.memory_space<vmem>>, vector<1x512xf32>
    %7 = vector.broadcast %6 : vector<1x512xf32> to vector<24x512xf32>
    %8 = arith.mulf %5, %7 : vector<24x512xf32>
    %9 = tpu.iota {dimensions = array<i32: 1>} : vector<1x512xi32>
    %c512_i32 = arith.constant 512 : i32
    %10 = arith.muli %arg0, %c512_i32 : i32
    %11 = vector.broadcast %10 : i32 to vector<1x512xi32>
    %12 = arith.addi %9, %11 : vector<1x512xi32>
    %c0_6 = arith.constant 0 : index
    %c0_7 = arith.constant 0 : index
    %13 = vector.load %arg2[%c0_6, %c0_7] : memref<24x1xi32, #tpu.memory_space<vmem>>, vector<24x1xi32>
    %14 = vector.broadcast %12 : vector<1x512xi32> to vector<24x512xi32>
    %15 = vector.broadcast %13 : vector<24x1xi32> to vector<24x512xi32>
    %16 = arith.cmpi eq, %14, %15 : vector<24x512xi32>
    %cst_8 = arith.constant 0.000000e+00 : f32
    %17 = vector.broadcast %cst_8 : f32 to vector<24x512xf32>
    %18 = arith.select %16, %8, %17 : vector<24x512xi1>, vector<24x512xf32>
    %cst_9 = arith.constant dense<0.000000e+00> : vector<24xf32>
    %19 = vector.multi_reduction <add>, %18, %cst_9 [1] : vector<24x512xf32> to vector<24xf32>
    %20 = vector.shape_cast %19 : vector<24xf32> to vector<24x1xf32>
    %21 = arith.mulf %20, %20 : vector<24x1xf32>
    %cst_10 = arith.constant 1.000000e+00 : f32
    %22 = vector.broadcast %cst_10 : f32 to vector<24x1xf32>
    %23 = arith.subf %22, %21 : vector<24x1xf32>
    %cst_11 = arith.constant 0.000000e+00 : f32
    %cst_12 = arith.constant 1.000000e+00 : f32
    %24 = vector.broadcast %cst_11 : f32 to vector<24x1xf32>
    %25 = arith.maximumf %24, %23 : vector<24x1xf32>
    %26 = vector.broadcast %cst_12 : f32 to vector<24x1xf32>
    %27 = arith.minimumf %26, %25 : vector<24x1xf32>
    %28 = math.sqrt %27 : vector<24x1xf32>
    %cst_13 = arith.constant 0.87758255 : f32
    %29 = vector.broadcast %cst_13 : f32 to vector<24x1xf32>
    %30 = arith.mulf %20, %29 : vector<24x1xf32>
    %cst_14 = arith.constant 0.47942555 : f32
    %31 = vector.broadcast %cst_14 : f32 to vector<24x1xf32>
    %32 = arith.mulf %28, %31 : vector<24x1xf32>
    %33 = arith.subf %30, %32 : vector<24x1xf32>
    %cst_15 = arith.constant -0.87758255 : f32
    %34 = vector.broadcast %cst_15 : f32 to vector<24x1xf32>
    %35 = arith.cmpf ogt, %20, %34 : vector<24x1xf32>
    %cst_16 = arith.constant 0.239712775 : f32
    %36 = vector.broadcast %cst_16 : f32 to vector<24x1xf32>
    %37 = arith.subf %20, %36 : vector<24x1xf32>
    %38 = arith.select %35, %33, %37 : vector<24x1xi1>, vector<24x1xf32>
    %39 = vector.shape_cast %38 : vector<24x1xf32> to vector<24x1xf32>
    %40 = vector.broadcast %39 : vector<24x1xf32> to vector<24x512xf32>
    %41 = arith.select %16, %40, %8 : vector<24x512xi1>, vector<24x512xf32>
    %cst_17 = arith.constant 6.400000e+01 : f32
    %42 = vector.broadcast %cst_17 : f32 to vector<24x512xf32>
    %43 = arith.mulf %41, %42 : vector<24x512xf32>
    %c0_18 = arith.constant 0 : index
    %c0_19 = arith.constant 0 : index
    %44 = vector.load %arg5[%c0_18, %c0_19] : memref<24x512xf32, #tpu.memory_space<vmem>>, vector<24x512xf32>
    tpu.vector_store %arg5[%c0_18, %c0_19], %43 {strides = array<i32>} : memref<24x512xf32, #tpu.memory_space<vmem>>, vector<24x512xf32>,
    return
  }
  func.func @transform_0(%arg0: i32, %arg1: i32) -> (i32, i32) {
    %c0_i32 = arith.constant 0 : i32
    %c0_i32_0 = arith.constant 0 : i32
    return %arg1, %c0_i32 : i32, i32
  }
  func.func @transform_1(%arg0: i32, %arg1: i32) -> (i32, i32) {
    %c0_i32 = arith.constant 0 : i32
    %c0_i32_0 = arith.constant 0 : i32
    return %arg1, %c0_i32 : i32, i32
  }
  func.func @transform_2(%arg0: i32, %arg1: i32) -> (i32, i32) {
    %c0_i32 = arith.constant 0 : i32
    %c0_i32_0 = arith.constant 0 : i32
    return %c0_i32, %arg0 : i32, i32
  }
  func.func @transform_3(%arg0: i32, %arg1: i32) -> (i32, i32) {
    %c0_i32 = arith.constant 0 : i32
    return %arg1, %arg0 : i32, i32
  }
}

</mosaic_0001>

<bundles_post_ra>
// kernel: tpu_custom_call.1
= control target key start
LH: loop header
LB: loop body
LE: loop exit
PB: predicated region body
PF: predicated region fallthrough
CT: control target
= control target key end

     0   :  { %8 = vsyncpa [#allocation4], 0  ;;  %s1942_s0 = inlined_call_operand.vmem [shape: s32[24,1], index: 0, kind: input, shape index: {}]   ;;  %s1943_s1 = inlined_call_operand.vmem [shape: f32[24,128], index: 1, kind: input, shape index: {}]   ;;  %s1944_s2 = inlined_call_operand.hbm [shape: f32[128,1024], index: 2, kind: input, shape index: {}]   ;;  %s1945_s3 = inlined_call_operand.hbm [shape: f32[24,1024], index: 3, kind: output, shape index: {}]  }
   0x1   :  { %10 = vsyncpa [#allocation4 + $0x1], 0 }
   0x2   :  { %11 = vsyncpa [#allocation5], 0 }
   0x3   :  { %13 = vsyncpa [#allocation5 + $0x1], 0  ;;  %s1269_s12 = smov 0   ;;  %s1271_s13 = smov 0  }
   0x4   :  { %s1273_s14 = smov 0   ;;  %s1275_s15 = smov 0  }
   0x5   :  { %s1277_s16 = smov 0   ;;  %s1279_s17 = smov 0  }
   0x6 LB: > { %s1021_s18 = sadd.s32 4294967295, %s1240_s17   ;;  %s1022_s19 = sadd.s32 4294967294, %s1240_s17   ;;  %s1240_s17 = sphi %s1279_s17, %s19_s17   ;;  %s1236_s16 = sphi %s1277_s16, %s2004_s16   ;;  %s1232_s15 = sphi %s1275_s15, %s2003_s15   ;;  %s1228_s14 = sphi %s1273_s14, %s2002_s14   ;;  %s1224_s13 = sphi %s1271_s13, %s2001_s13   ;;  %s1220_s12 = sphi %s1269_s12, %s2000_s12  }
   0x7   : > { %s31_s20 = sadd.s32 1, %s1236_s16  ;;  %s90_s21 = sadd.s32 1, %s1228_s14 }
   0x8   : > { %p33_p0 = scmp.ge.s32.totalorder %s31_s20, 2  ;;  %p97_p1 = scmp.ne.s32.totalorder %s1228_s14, %s1224_s13 }
   0x9   : > { %p98_p2 = scmp.eq.s32.totalorder %s1240_s17, 0  ;;  %p103_p3 = scmp.ne.s32.totalorder %s1224_s13, %s1220_s12 }
   0xa   : > { %s2006_s20 = smov (%p33_p0, %s31_s20), 0  ;;  %p104_p5 = scmp.eq.s32.totalorder %s1021_s18, 0 }
   0xb   : > { %p1310_p4 = por %p98_p2, %p97_p1  ;;  %s87_s23 = ssub.s32 %s1236_s16, %s2006_s20 }
   0xc   : > { %p129_p6 = scmp.eq.s32.totalorder %s1021_s18, 1  ;;  %p88_p7 = scmp.eq.s32.totalorder %s87_s23, 0 }
   0xd   : > { %p1316_p8 = por %p104_p5, %p103_p3  ;;  %p135_p10 = scmp.eq.s32.totalorder %s1022_s19, 1 }
   0xe   : > { %p1320_p9 = por %p129_p6, %p97_p1  ;;  %p1026_p12 = scmp.ge.s32.totalorder %s1240_s17, 2 }
   0xf   : > { %s1325_s26 = scalar_select %p88_p7, %s1228_s14, %s90_s21  }
  0x10   : > { %p1327_p11 = por %p135_p10, %p103_p3  ;;  %p1055_p13 = scmp.lt.s32.totalorder %s1240_s17, 2 }
  0x11   : > { %s173_s28 = sand.u32 1, %s1228_s14   ;;  %s1040_s30 = sshll.u32 %s1236_s16, 5 }
  0x12   : > { %s1027_s29 = sshll.u32 %s173_s28, 9  ;;  %s182_s6 = scalar_lea.hbm %s1944_s2, %s1040_s30 }
  0x13   : > { %s177_s7 = scalar_lea.vmem [#allocation3], %s1027_s29  ;;  %s183_s9 = sshll.u32 %s182_s6, 4  ;;  %s184_s9 = int_to_ptr.hbm [resolvable:$true] %s183_s9 }
  0x14   : > { %s185_s8 = sshll.u32 %s177_s7, 4  ;;  %p1048_p0 = pnand %p1055_p13, %p1310_p4  ;;  %s186_s8 = int_to_ptr.vmem [resolvable:$true] %s185_s8 }
  0x15   : > { %s174_s10 = scalar_lea.sflag [#allocation4], %s173_s28  ;;  %s1242_s11 = smov 1024  }
  0x16   : > { %s1243_s18 = smov 512   ;;  %s1244_s19 = smov 32  }
  0x17   : > { %1050 = dma.hbm_to_vmem [thread:$0]  (!%p1048_p0), %s184_s9, 8192, %s186_s8, %s174_s10, %s1242_s11, %s1243_s18, %s1244_s19  }
  0x18   : > { %p1030_p1 = scmp.ge.s32.totalorder %s1240_s17, 1  ;;  %p193_p2 = scmp.lt.s32.totalorder %s1240_s17, 3 }
  0x1a   : > { %p194_p3 = pnand %p1030_p1, %p193_p2 }
  0x1c   : > { %197 = sbr.rel (%p194_p3) target bundleno = 390 (0x186), region = 32 }
  0x21   : > { %s1343_s21 = sand.u32 1, %s1224_s13  }
  0x22   : > { %s1031_s23 = sshll.u32 %s1343_s21, 9  ;;  %s200_s29 = scalar_lea.sflag [#allocation4], %s1343_s21 }
  0x23   : > { %s1347_s30 = scalar_lea.vmem [#allocation3], %s1031_s23 }
  0x24   : > { %1211 = dma.done.wait (%p1316_p8), %s200_s29, 8192  }
  0x25   : > { %1213 = vsyncadd (%p1316_p8), %s200_s29, 4294959104  ;;  %v1354_v0 = vld [vmem:[%s1347_s30 + $0x1e0] sm:$0xff]  ;;  %v1357_v1 = vld [vmem:[%s1347_s30 + $0x1e8] sm:$0xff]  ;;  %vm519_vm12 = vcmask 1040384   ;;  %vm521_vm13 = vcmask 1042434   ;;  %vm523_vm14 = vcmask 1041408  }
  0x26   : > { %1966 = vst [vmem:[#allocation9_spill] sm:$0xff] %v1354_v0  ;;  %v1360_v2 = vld [vmem:[%s1347_s30 + $0x1f0] sm:$0xff]  ;;  %598 = vmatpush.msra.mxu0 %v1354_v0  ;;  %624 = vmatpush.msra.mxu1 %v1357_v1  ;;  %v1365_v3 = vld [vmem:[%s1347_s30 + $0x1f8] sm:$0xff]  ;;  %v1368_v4 = vld [vmem:[%s1347_s30 + $0x1c0] sm:$0xff]  ;;  %s1032_s19 = sshll.u32 %s1232_s15, 9  ;;  %s1042_s23 = smul.u32 96, %s1343_s21 }
  0x27   : > { %1967 = vst [vmem:[#allocation10_spill] sm:$0xff] %v1357_v1  ;;  %v1371_v5 = vld [vmem:[%s1347_s30 + $0x1c8] sm:$0xff]  ;;  %650 = vmatpush.msra.mxu2 %v1360_v2  ;;  %676 = vmatpush.msra.mxu3 %v1365_v3  ;;  %v1376_v6 = vld [vmem:[%s1347_s30 + $0x1d0] sm:$0xff]  ;;  %v1379_v7 = vld [vmem:[%s1347_s30 + $0x1d8] sm:$0xff]  ;;  %v1245_v1 = vmov 0   ;;  %s889_s5 = scalar_lea.sflag [#allocation5], %s1343_s21 }
  0x28   : > { %1968 = vst [vmem:[#allocation11_spill] sm:$0xff] %v1360_v2  ;;  %v1382_v8 = vld [vmem:[%s1347_s30 + $0x1a0] sm:$0xff]  ;;  %599 = vmatpush.msra.mxu0 %v1368_v4  ;;  %625 = vmatpush.msra.mxu1 %v1371_v5  ;;  %v1387_v9 = vld [vmem:[%s1347_s30 + $0x1a8] sm:$0xff]  ;;  %v1390_v10 = vld [vmem:[%s1347_s30 + $0x1b0] sm:$0xff]  ;;  %s1846_s29 = scalar_lea.vmem [#allocation6], %s1042_s23  ;;  %s1178_s10 = scalar_lea.hbm %s1945_s3, 192 }
  0x29   : > { %1969 = vst [vmem:[#allocation12_spill] sm:$0xff] %v1365_v3  ;;  %v1393_v11 = vld [vmem:[%s1347_s30 + $0x1b8] sm:$0xff]  ;;  %651 = vmatpush.msra.mxu2 %v1376_v6  ;;  %677 = vmatpush.msra.mxu3 %v1379_v7  ;;  %v1398_v12 = vld [vmem:[%s1347_s30 + $0x180] sm:$0xff]  ;;  %v1401_v13 = vld [vmem:[%s1347_s30 + $0x188] sm:$0xff] }
  0x2a   : > { %1970 = vst [vmem:[#allocation13_spill] sm:$0xff] %v1368_v4  ;;  %600 = vmatpush.msra.mxu0 %v1382_v8  ;;  %626 = vmatpush.msra.mxu1 %v1387_v9  ;;  %v1406_v14 = vld [vmem:[%s1347_s30 + $0x190] sm:$0xff]  ;;  %v1409_v15 = vld [vmem:[%s1347_s30 + $0x198] sm:$0xff]  ;;  %v1414_v16 = vld [vmem:[%s1347_s30 + $0x160] sm:$0xff] }
  0x2b   : > { %1971 = vst [vmem:[#allocation14_spill] sm:$0xff] %v1371_v5  ;;  %652 = vmatpush.msra.mxu2 %v1390_v10  ;;  %678 = vmatpush.msra.mxu3 %v1393_v11  ;;  %v1417_v17 = vld [vmem:[%s1347_s30 + $0x168] sm:$0xff]  ;;  %v1422_v18 = vld [vmem:[%s1347_s30 + $0x170] sm:$0xff]  ;;  %v1425_v19 = vld [vmem:[%s1347_s30 + $0x178] sm:$0xff] }
  0x2c   : > { %1972 = vst [vmem:[#allocation15_spill] sm:$0xff] %v1376_v6  ;;  %601 = vmatpush.msra.mxu0 %v1398_v12  ;;  %627 = vmatpush.msra.mxu1 %v1401_v13  ;;  %v1430_v20 = vld [vmem:[%s1347_s30 + $0x140] sm:$0xff]  ;;  %v1433_v21 = vld [vmem:[%s1347_s30 + $0x148] sm:$0xff]  ;;  %v1438_v22 = vld [vmem:[%s1347_s30 + $0x150] sm:$0xff] }
  0x2d   : > { %1973 = vst [vmem:[#allocation16_spill] sm:$0xff] %v1379_v7  ;;  %653 = vmatpush.msra.mxu2 %v1406_v14  ;;  %679 = vmatpush.msra.mxu3 %v1409_v15  ;;  %v1441_v23 = vld [vmem:[%s1347_s30 + $0x158] sm:$0xff]  ;;  %v1446_v24 = vld [vmem:[%s1347_s30 + $0x120] sm:$0xff]  ;;  %v1449_v25 = vld [vmem:[%s1347_s30 + $0x128] sm:$0xff] }
  0x2e   : > { %1974 = vst [vmem:[#allocation17_spill] sm:$0xff] %v1382_v8  ;;  %602 = vmatpush.msra.mxu0 %v1414_v16  ;;  %628 = vmatpush.msra.mxu1 %v1417_v17  ;;  %v1454_v26 = vld [vmem:[%s1347_s30 + $0x130] sm:$0xff]  ;;  %v1457_v27 = vld [vmem:[%s1347_s30 + $0x138] sm:$0xff]  ;;  %v1462_v28 = vld [vmem:[%s1347_s30 + $0x100] sm:$0xff] }
  0x2f   : > { %1975 = vst [vmem:[#allocation18_spill] sm:$0xff] %v1387_v9  ;;  %654 = vmatpush.msra.mxu2 %v1422_v18  ;;  %680 = vmatpush.msra.mxu3 %v1425_v19  ;;  %v1465_v29 = vld [vmem:[%s1347_s30 + $0x108] sm:$0xff]  ;;  %v1470_v30 = vld [vmem:[%s1347_s30 + $0x110] sm:$0xff]  ;;  %v1473_v31 = vld [vmem:[%s1347_s30 + $0x118] sm:$0xff] }
  0x30   : > { %1976 = vst [vmem:[#allocation19_spill] sm:$0xff] %v1390_v10  ;;  %603 = vmatpush.msra.mxu0 %v1430_v20  ;;  %629 = vmatpush.msra.mxu1 %v1433_v21  ;;  %v1478_v32 = vld [vmem:[%s1347_s30 + $0xe0] sm:$0xff]  ;;  %v1481_v33 = vld [vmem:[%s1347_s30 + $0xe8] sm:$0xff]  ;;  %v1486_v34 = vld [vmem:[%s1347_s30 + $0xf0] sm:$0xff] }
  0x31   : > { %1977 = vst [vmem:[#allocation20_spill] sm:$0xff] %v1393_v11  ;;  %655 = vmatpush.msra.mxu2 %v1438_v22  ;;  %681 = vmatpush.msra.mxu3 %v1441_v23  ;;  %v1489_v35 = vld [vmem:[%s1347_s30 + $0xf8] sm:$0xff]  ;;  %v1494_v36 = vld [vmem:[%s1347_s30 + $0xc0] sm:$0xff]  ;;  %v1497_v37 = vld [vmem:[%s1347_s30 + $0xc8] sm:$0xff] }
  0x32   : > { %1978 = vst [vmem:[#allocation21_spill] sm:$0xff] %v1398_v12  ;;  %604 = vmatpush.msra.mxu0 %v1446_v24  ;;  %630 = vmatpush.msra.mxu1 %v1449_v25  ;;  %v1502_v38 = vld [vmem:[%s1347_s30 + $0xd0] sm:$0xff]  ;;  %v1505_v39 = vld [vmem:[%s1347_s30 + $0xd8] sm:$0xff]  ;;  %v1510_v40 = vld [vmem:[%s1347_s30 + $0xa0] sm:$0xff] }
  0x33   : > { %1979 = vst [vmem:[#allocation22_spill] sm:$0xff] %v1401_v13  ;;  %656 = vmatpush.msra.mxu2 %v1454_v26  ;;  %682 = vmatpush.msra.mxu3 %v1457_v27  ;;  %v1513_v41 = vld [vmem:[%s1347_s30 + $0xa8] sm:$0xff]  ;;  %v1518_v42 = vld [vmem:[%s1347_s30 + $0xb0] sm:$0xff]  ;;  %v1521_v43 = vld [vmem:[%s1347_s30 + $0xb8] sm:$0xff] }
  0x34   : > { %1980 = vst [vmem:[#allocation23_spill] sm:$0xff] %v1406_v14  ;;  %605 = vmatpush.msra.mxu0 %v1462_v28  ;;  %631 = vmatpush.msra.mxu1 %v1465_v29  ;;  %v1526_v44 = vld [vmem:[%s1347_s30 + $0x80] sm:$0xff]  ;;  %v1529_v45 = vld [vmem:[%s1347_s30 + $0x88] sm:$0xff]  ;;  %v1534_v46 = vld [vmem:[%s1347_s30 + $0x90] sm:$0xff] }
  0x35   : > { %1981 = vst [vmem:[#allocation24_spill] sm:$0xff] %v1409_v15  ;;  %657 = vmatpush.msra.mxu2 %v1470_v30  ;;  %683 = vmatpush.msra.mxu3 %v1473_v31  ;;  %v1537_v47 = vld [vmem:[%s1347_s30 + $0x98] sm:$0xff]  ;;  %v1542_v48 = vld [vmem:[%s1347_s30 + $0x60] sm:$0xff]  ;;  %v1545_v49 = vld [vmem:[%s1347_s30 + $0x68] sm:$0xff] }
  0x36   : > { %606 = vmatpush.msra.mxu0 %v1478_v32  ;;  %632 = vmatpush.msra.mxu1 %v1481_v33  ;;  %v1550_v50 = vld [vmem:[%s1347_s30 + $0x70] sm:$0xff]  ;;  %v1553_v51 = vld [vmem:[%s1347_s30 + $0x78] sm:$0xff]  ;;  %v1558_v52 = vld [vmem:[%s1347_s30 + $0x40] sm:$0xff] }
  0x37   : > { %658 = vmatpush.msra.mxu2 %v1486_v34  ;;  %684 = vmatpush.msra.mxu3 %v1489_v35  ;;  %v543_v53 = vld [vmem:[%s1347_s30 + $0x48] sm:$0xff]  ;;  %v544_v54 = vld [vmem:[%s1347_s30 + $0x50] sm:$0xff]  ;;  %v545_v55 = vld [vmem:[%s1347_s30 + $0x58] sm:$0xff]  ;;  %v328_v13 = vmul.f32 %v1558_v52, %v1558_v52 }
  0x38   : > { %607 = vmatpush.msra.mxu0 %v1494_v36  ;;  %633 = vmatpush.msra.mxu1 %v1497_v37  ;;  %v538_v56 = vld [vmem:[%s1347_s30 + $0x20] sm:$0xff]  ;;  %v539_v57 = vld [vmem:[%s1347_s30 + $0x28] sm:$0xff]  ;;  %v540_v58 = vld [vmem:[%s1347_s30 + $0x30] sm:$0xff]  ;;  %v329_v9 = vmul.f32 %v543_v53, %v543_v53  ;;  %v330_v12 = vmul.f32 %v544_v54, %v544_v54 }
  0x39   : > { %659 = vmatpush.msra.mxu2 %v1502_v38  ;;  %685 = vmatpush.msra.mxu3 %v1505_v39  ;;  %v541_v59 = vld [vmem:[%s1347_s30 + $0x38] sm:$0xff]  ;;  %v534_v60 = vld [vmem:[%s1347_s30] sm:$0xff]  ;;  %v535_v61 = vld [vmem:[%s1347_s30 + $0x8] sm:$0xff]  ;;  %v325_v6 = vmul.f32 %v539_v57, %v539_v57  ;;  %v326_v5 = vmul.f32 %v540_v58, %v540_v58  ;;  %v324_v10 = vmul.f32 %v538_v56, %v538_v56 }
  0x3a   : > { %608 = vmatpush.msra.mxu0 %v1510_v40  ;;  %634 = vmatpush.msra.mxu1 %v1513_v41  ;;  %v536_v62 = vld [vmem:[%s1347_s30 + $0x10] sm:$0xff]  ;;  %v537_v63 = vld [vmem:[%s1347_s30 + $0x18] sm:$0xff]  ;;  %v532_v4 = vld [vmem:[%s1943_s1 + $0x8] sm:$0xff]  ;;  %v327_v8 = vmul.f32 %v541_v59, %v541_v59  ;;  %v320_v11 = vmul.f32 %v534_v60, %v534_v60  ;;  %s1041_s30 = sshll.u32 %s1232_s15, 5  ;;  %s904_s15 = sshll.u32 %s1846_s29, 4  ;;  %s905_s15 = int_to_ptr.vmem [resolvable:$true] %s904_s15 }
  0x3b   : > { %660 = vmatpush.msra.mxu2 %v1518_v42  ;;  %686 = vmatpush.msra.mxu3 %v1521_v43  ;;  %v531_v0 = vld [vmem:[%s1943_s1] sm:$0xff]  ;;  %v737_v2 = vld [vmem:[%s1942_s0 + $0x10] sm:$0xff]  ;;  %v736_v7 = vld [vmem:[%s1942_s0 + $0x8] sm:$0xff]  ;;  %s903_s28 = scalar_lea.hbm %s1945_s3, %s1041_s30 }
  0x3c   : > { %609 = vmatpush.msra.mxu0 %v1526_v44  ;;  %635 = vmatpush.msra.mxu1 %v1529_v45  ;;  %v735_v3 = vld [vmem:[%s1942_s0] sm:$0xff]  ;;  %s906_s4 = sshll.u32 %s903_s28, 4  ;;  %s907_s4 = int_to_ptr.hbm [resolvable:$true] %s906_s4 }
  0x3d   : > { %661 = vmatpush.msra.mxu2 %v1534_v46  ;;  %687 = vmatpush.msra.mxu3 %v1537_v47  ;;  %s1172_s6 = sshra.s32 %s907_s4, 4  ;;  %s1173_s6 = int_to_ptr.hbm [resolvable:$true] %s1172_s6 }
  0x3e   : > { %610 = vmatpush.msra.mxu0 %v1542_v48  ;;  %636 = vmatpush.msra.mxu1 %v1545_v49  ;;  %s1174_s7 = scalar_lea.hbm %s1173_s6, 96  ;;  %p1179_p7 = scmp.lt.s32.totalorder %s1173_s6, %s1945_s3 }
  0x3f   : > { %662 = vmatpush.msra.mxu2 %v1550_v50  ;;  %688 = vmatpush.msra.mxu3 %v1553_v51  ;;  %p1175_p4 = scmp.ne.s32.totalorder %s1173_s6, %s1174_s7  ;;  %p1180_p8 = scmp.lt.s32.totalorder %s1178_s10, %s1174_s7 }
  0x40   : > { %611 = vmatpush.msra.mxu0 %v1558_v52  ;;  %637 = vmatpush.msra.mxu1 %v543_v53 }
  0x41   : > { %663 = vmatpush.msra.mxu2 %v544_v54  ;;  %689 = vmatpush.msra.mxu3 %v545_v55  ;;  %p1176_p5 = pnand %p1175_p4, %p1320_p9  ;;  %p1181_p10 = por %p1180_p8, %p1179_p7 }
  0x42   : > { %612 = vmatpush.msra.mxu0 %v538_v56  ;;  %638 = vmatpush.msra.mxu1 %v539_v57  ;;  %v335_v57 = vmul.f32 %v1553_v51, %v1553_v51 }
  0x43   : > { %664 = vmatpush.msra.mxu2 %v540_v58  ;;  %690 = vmatpush.msra.mxu3 %v541_v59  ;;  %v384_v58 = vadd.f32 %v324_v10, %v320_v11  ;;  %v341_v10 = vmul.f32 %v1513_v41, %v1513_v41  ;;  %v342_v11 = vmul.f32 %v1518_v42, %v1518_v42  ;;  %p1177_p6 = pneg %p1176_p5 }
  0x44   : > { %613 = vmatpush.msra.mxu0 %v534_v60  ;;  %639 = vmatpush.msra.mxu1 %v535_v61  ;;  %v347_v41 = vmul.f32 %v1505_v39, %v1505_v39  ;;  %v344_v60 = vmul.f32 %v1494_v36, %v1494_v36  ;;  %v354_v36 = vmul.f32 %v1470_v30, %v1470_v30 }
  0x45   : > { %665 = vmatpush.msra.mxu2 %v536_v62  ;;  %691 = vmatpush.msra.mxu3 %v537_v63  ;;  %p1182_p13 = pnand %p1181_p10, %p1177_p6 }
  0x46   : > { %614 = vmatmul.f32.vlgmr.msra.gmra.mxu0 %v531_v0  ;;  %640 = vmatmul.f32.vlgmr.msra.gmra.mxu1 %v531_v0 }
  0x47   : > { %666 = vmatmul.f32.vlgmr.msra.gmra.mxu2 %v531_v0  ;;  %692 = vmatmul.f32.vlgmr.msra.gmra.mxu3 %v531_v0  ;;  %v533_v0 = vld [vmem:[%s1943_s1 + $0x10] sm:$0xff] }
  0x48   : > { %1112 = vset.pattern.permute.xlu0 %v1245_v1  ;;  %1113 = vset.pattern.permute.xlu1 %v1245_v1  ;;  %v321_v1 = vmul.f32 %v535_v61, %v535_v61  ;;  %v334_v61 = vmul.f32 %v1550_v50, %v1550_v50  ;;  %v385_v50 = vadd.f32 %v384_v58, %v328_v13 }
  0x49   : > { %739 = vperm.xlu0 %1112, %v735_v3   ;;  %745 = vperm.xlu1 %1113, %v737_v2   ;;  %v322_v2 = vmul.f32 %v536_v62, %v536_v62  ;;  %v323_v3 = vmul.f32 %v537_v63, %v537_v63  ;;  %v340_v13 = vmul.f32 %v1510_v40, %v1510_v40 }
  0x4a   : > { %v349_v62 = vmul.f32 %v1481_v33, %v1481_v33  ;;  %v350_v40 = vmul.f32 %v1486_v34, %v1486_v34  ;;  %v355_v33 = vmul.f32 %v1473_v31, %v1473_v31 }
  0x4b   : > { %v426_v15 = vadd.f32 %v326_v5, %v322_v2  ;;  %v447_v14 = vadd.f32 %v327_v8, %v323_v3  ;;  %v332_v5 = vmul.f32 %v1542_v48, %v1542_v48  ;;  %v338_v8 = vmul.f32 %v1534_v46, %v1534_v46 }
  0x4c   : > { %v348_v2 = vmul.f32 %v1478_v32, %v1478_v32  ;;  %v353_v3 = vmul.f32 %v1465_v29, %v1465_v29  ;;  %v358_v32 = vmul.f32 %v1454_v26, %v1454_v26  ;;  %v359_v29 = vmul.f32 %v1457_v27, %v1457_v27 }
  0x4d   : > { %v427_v53 = vadd.f32 %v426_v15, %v330_v12  ;;  %v343_v12 = vmul.f32 %v1521_v43, %v1521_v43 }
  0x4e   : > { %617 = vmatmul.f32.gmra.mxu0 %v532_v4  ;;  %643 = vmatmul.f32.gmra.mxu1 %v532_v4 }
  0x4f   : > { %669 = vmatmul.f32.gmra.mxu2 %v532_v4  ;;  %695 = vmatmul.f32.gmra.mxu3 %v532_v4  ;;  %v331_v4 = vmul.f32 %v545_v55, %v545_v55  ;;  %v428_v55 = vadd.f32 %v427_v53, %v334_v61  ;;  %v357_v61 = vmul.f32 %v1449_v25, %v1449_v25 }
  0x50   : > { %v361_v53 = vmul.f32 %v1433_v21, %v1433_v21  ;;  %v363_v25 = vmul.f32 %v1441_v23, %v1441_v23  ;;  %v367_v21 = vmul.f32 %v1425_v19, %v1425_v19 }
  0x51   : > { %742 = vperm.xlu0 %1112, %v736_v7   ;;  %v405_v7 = vadd.f32 %v325_v6, %v321_v1  ;;  %v448_v54 = vadd.f32 %v447_v14, %v331_v4  ;;  %v337_v6 = vmul.f32 %v1529_v45, %v1529_v45  ;;  %v386_v14 = vadd.f32 %v385_v50, %v332_v5 }
  0x52   : > { %v429_v45 = vadd.f32 %v428_v55, %v338_v8  ;;  %v365_v8 = vmul.f32 %v1417_v17, %v1417_v17  ;;  %v1982_v55 = vld [vmem:[#allocation22_spill] sm:$0xff]  ;;  %v1984_v17 = vld [vmem:[#allocation24_spill] sm:$0xff] }
  0x53   : > { %v406_v56 = vadd.f32 %v405_v7, %v329_v9  ;;  %v449_v51 = vadd.f32 %v448_v54, %v335_v57  ;;  %v336_v9 = vmul.f32 %v1526_v44, %v1526_v44  ;;  %v346_v44 = vmul.f32 %v1502_v38, %v1502_v38 }
  0x54   : > { %v430_v59 = vadd.f32 %v429_v45, %v342_v11  ;;  %v1986_v45 = vld [vmem:[#allocation18_spill] sm:$0xff] }
  0x55   : > { %v387_v42 = vadd.f32 %v386_v14, %v336_v9  ;;  %v1985_v14 = vld [vmem:[#allocation21_spill] sm:$0xff] }
  0x56   : > { %620 = vmatmul.f32.gmra.mxu0 %v533_v0  ;;  %646 = vmatmul.f32.gmra.mxu1 %v533_v0  ;;  %v431_v1 = vadd.f32 %v430_v59, %v346_v44 }
  0x57   : > { %672 = vmatmul.f32.gmra.mxu2 %v533_v0  ;;  %698 = vmatmul.f32.gmra.mxu3 %v533_v0  ;;  %v333_v0 = vmul.f32 %v1545_v49, %v1545_v49  ;;  %v339_v49 = vmul.f32 %v1537_v47, %v1537_v47  ;;  %v345_v47 = vmul.f32 %v1497_v37, %v1497_v37 }
  0x58   : > { %v351_v37 = vmul.f32 %v1489_v35, %v1489_v35  ;;  %v388_v38 = vadd.f32 %v387_v42, %v340_v13  ;;  %v432_v7 = vadd.f32 %v431_v1, %v350_v40 }
  0x59   : > { %v407_v52 = vadd.f32 %v406_v56, %v333_v0  ;;  %v450_v46 = vadd.f32 %v449_v51, %v339_v49  ;;  %v352_v0 = vmul.f32 %v1462_v28, %v1462_v28  ;;  %v356_v56 = vmul.f32 %v1446_v24, %v1446_v24 }
  0x5a   : > { %v389_v34 = vadd.f32 %v388_v38, %v344_v60  ;;  %v433_v58 = vadd.f32 %v432_v7, %v354_v36  ;;  %v362_v28 = vmul.f32 %v1438_v22, %v1438_v22  ;;  %v366_v24 = vmul.f32 %v1422_v18, %v1422_v18 }
  0x5b   : > { %v408_v15 = vadd.f32 %v407_v52, %v337_v6  ;;  %v451_v43 = vadd.f32 %v450_v46, %v343_v12  ;;  %v360_v6 = vmul.f32 %v1430_v20, %v1430_v20  ;;  %v364_v52 = vmul.f32 %v1414_v16, %v1414_v16  ;;  %v1983_v20 = vld [vmem:[#allocation23_spill] sm:$0xff] }
  0x5c   : > { %v390_v30 = vadd.f32 %v389_v34, %v348_v2  ;;  %v434_v5 = vadd.f32 %v433_v58, %v358_v32  ;;  %v369_v51 = vmul.f32 %v1982_v55, %v1982_v55  ;;  %v370_v9 = vmul.f32 %v1983_v20, %v1983_v20  ;;  %v1987_v16 = vld [vmem:[#allocation19_spill] sm:$0xff] }
  0x5d   : > { %v409_v48 = vadd.f32 %v408_v15, %v341_v10  ;;  %v452_v39 = vadd.f32 %v451_v43, %v347_v41  ;;  %v371_v10 = vmul.f32 %v1984_v17, %v1984_v17  ;;  %v368_v15 = vmul.f32 %v1985_v14, %v1985_v14  ;;  %v1989_v43 = vld [vmem:[#allocation17_spill] sm:$0xff] }
  0x5e   : > { %v391_v26 = vadd.f32 %v390_v30, %v352_v0  ;;  %v435_v50 = vadd.f32 %v434_v5, %v362_v28  ;;  %v373_v46 = vmul.f32 %v1986_v45, %v1986_v45  ;;  %v374_v13 = vmul.f32 %v1987_v16, %v1987_v16 }
  0x5f   : > { %v410_v63 = vadd.f32 %v409_v48, %v345_v47  ;;  %v453_v35 = vadd.f32 %v452_v39, %v351_v37  ;;  %v1988_v47 = vld [vmem:[#allocation20_spill] sm:$0xff]  ;;  %v372_v60 = vmul.f32 %v1989_v43, %v1989_v43  ;;  %v1991_v37 = vld [vmem:[#allocation15_spill] sm:$0xff] }
  0x60   : > { %v392_v22 = vadd.f32 %v391_v26, %v356_v56  ;;  %v436_v12 = vadd.f32 %v435_v50, %v366_v24  ;;  %v375_v44 = vmul.f32 %v1988_v47, %v1988_v47  ;;  %v378_v38 = vmul.f32 %v1991_v37, %v1991_v37 }
  0x61   : > { %v411_v4 = vadd.f32 %v410_v63, %v349_v62  ;;  %v454_v31 = vadd.f32 %v453_v35, %v355_v33  ;;  %v1990_v62 = vld [vmem:[#allocation14_spill] sm:$0xff]  ;;  %v1992_v63 = vld [vmem:[#allocation16_spill] sm:$0xff]  ;;  %v1993_v33 = vld [vmem:[#allocation13_spill] sm:$0xff] }
  0x62   : > { %v393_v18 = vadd.f32 %v392_v22, %v360_v6  ;;  %v437_v48 = vadd.f32 %v436_v12, %v370_v9  ;;  %v377_v40 = vmul.f32 %v1990_v62, %v1990_v62  ;;  %v379_v1 = vmul.f32 %v1992_v63, %v1992_v63  ;;  %v1995_v35 = vld [vmem:[#allocation11_spill] sm:$0xff] }
  0x63   : > { %v412_v57 = vadd.f32 %v411_v4, %v353_v3  ;;  %v455_v27 = vadd.f32 %v454_v31, %v359_v29  ;;  %v376_v34 = vmul.f32 %v1993_v33, %v1993_v33  ;;  %v1994_v4 = vld [vmem:[#allocation10_spill] sm:$0xff]  ;;  %v382_v0 = vmul.f32 %v1995_v35, %v1995_v35  ;;  %v1997_v31 = vld [vmem:[#allocation9_spill] sm:$0xff] }
  0x64   : > { %v394_v41 = vadd.f32 %v393_v18, %v364_v52  ;;  %v438_v3 = vadd.f32 %v437_v48, %v374_v13  ;;  %v381_v7 = vmul.f32 %v1994_v4, %v1994_v4  ;;  %v380_v56 = vmul.f32 %v1997_v31, %v1997_v31 }
  0x65   : > { %v413_v54 = vadd.f32 %v412_v57, %v357_v61  ;;  %v456_v23 = vadd.f32 %v455_v27, %v363_v25  ;;  %v1996_v61 = vld [vmem:[#allocation12_spill] sm:$0xff] }
  0x66   : > { %v395_v39 = vadd.f32 %v394_v41, %v368_v15  ;;  %v383_v32 = vmul.f32 %v1996_v61, %v1996_v61  ;;  %v439_v57 = vadd.f32 %v438_v3, %v378_v38 }
  0x67   : > { %v414_v49 = vadd.f32 %v413_v54, %v361_v53  ;;  %v457_v19 = vadd.f32 %v456_v23, %v367_v21 }
  0x68   : > { %v396_v29 = vadd.f32 %v395_v39, %v372_v60  ;;  %v440_v25 = vadd.f32 %v439_v57, %v382_v0 }
  0x69   : > { %v415_v11 = vadd.f32 %v414_v49, %v365_v8  ;;  %v458_v59 = vadd.f32 %v457_v19, %v371_v10 }
  0x6a   : > { %v397_v53 = vadd.f32 %v396_v29, %v376_v34  ;;  %v441_v27 = vrot.slane %v440_v25, 4 }
  0x6b   : > { %v416_v42 = vadd.f32 %v415_v11, %v369_v51  ;;  %v459_v36 = vadd.f32 %v458_v59, %v375_v44 }
  0x6c   : > { %v398_v54 = vadd.f32 %v397_v53, %v380_v56  ;;  %v442_v21 = vadd.f32 %v441_v27, %v440_v25  ;;  %v526_v53 = vlaneseq }
  0x6d   : > { %v417_v2 = vadd.f32 %v416_v42, %v373_v46  ;;  %v460_v58 = vadd.f32 %v459_v36, %v379_v1 }
  0x6e   : > { %v399_v8 = vrot.slane %v398_v54, 4  ;;  %v443_v23 = vrot.slane %v442_v21, 2  ;;  %vm528_vm15 = vcmp.lt.s32.totalorder %v526_v53, 512 }
  0x6f   : > { %v418_v30 = vadd.f32 %v417_v2, %v377_v40  ;;  %v461_v26 = vadd.f32 %v460_v58, %v383_v32 }
  0x70   : > { %v400_v49 = vadd.f32 %v399_v8, %v398_v54  ;;  %v444_v20 = vadd.f32 %v443_v23, %v442_v21  ;;  %v730_v8 = vstv %s1032_s19 }
  0x71   : > { %v419_v28 = vadd.f32 %v418_v30, %v381_v7  ;;  %v462_v6 = vrot.slane %v461_v26, 4 }
  0x72   : > { %v401_v55 = vrot.slane %v400_v49, 2  ;;  %v445_v18 = vrot.slane %v444_v20, 1 }
  0x73   : > { %v420_v5 = vrot.slane %v419_v28, 4  ;;  %v463_v22 = vadd.f32 %v462_v6, %v461_v26 }
  0x74   : > { %v402_v17 = vadd.f32 %v401_v55, %v400_v49  ;;  %v446_v14 = vadd.f32 %v445_v18, %v444_v20 }
  0x75   : > { %v421_v24 = vadd.f32 %v420_v5, %v419_v28  ;;  %v464_v52 = vrot.slane %v463_v22, 2  ;;  %v725_v5 = vand.u32 127, %v526_v53 }
  0x76   : > { %v403_v12 = vrot.slane %v402_v17, 1  ;;  %v470_v16 = vmax.f32 %v446_v14, 1e-24 }
  0x77   : > { %v422_v50 = vrot.slane %v421_v24, 2  ;;  %v465_v9 = vadd.f32 %v464_v52, %v463_v22  ;;  %v726_v27 = vadd.s32 128, %v725_v5  ;;  %v1707_v21 = vadd.s32 %v730_v8, %v725_v5 }
  0x78   : > { %v404_v45 = vadd.f32 %v403_v12, %v402_v17  ;;  %vm498_vm2 = vweird.f32 %v470_v16  ;;  %v727_v55 = vadd.s32 256, %v725_v5 }
  0x79   : > { %v423_v51 = vadd.f32 %v422_v50, %v421_v24  ;;  %v466_v11 = vrot.slane %v465_v9, 1  ;;  %v1709_v49 = vadd.s32 %v730_v8, %v726_v27 }
  0x7a   : > { %v468_v47 = vmax.f32 %v404_v45, 1e-24  ;;  %v1729_v12 = vadd.s32 %v730_v8, %v727_v55 }
  0x7b   : > { %v424_v10 = vrot.slane %v423_v51, 1  ;;  %v467_v15 = vadd.f32 %v466_v11, %v465_v9  ;;  %v728_v9 = vadd.s32 384, %v725_v5 }
  0x7c   : > { %vm478_vm5 = vweird.f32 %v468_v47 }
  0x7d   : > { %v425_v19 = vadd.f32 %v424_v10, %v423_v51  ;;  %v471_v13 = vmax.f32 %v467_v15, 1e-24  ;;  %v1731_v45 = vadd.s32 %v730_v8, %v728_v9 }
  0x7f   : > { %v469_v46 = vmax.f32 %v425_v19, 1e-24  ;;  %vm508_vm8 = vweird.f32 %v471_v13 }
  0x81   : > { %1114 = vrsqrt.f32 %v469_v46  ;;  %vm488_vm0 = vweird.f32 %v469_v46 }
  0x82   : > { %1116 = vrsqrt.f32 %v470_v16 }
  0x83   : > { %1118 = vrsqrt.f32 %v468_v47 }
  0x84   : > { %1120 = vrsqrt.f32 %v471_v13 }
  0x87   : > { %v1115_v44 = vpop.eup %1114 }
  0x88   : > { %v1117_v41 = vpop.eup %1116  ;;  %v483_v42 = vmul.f32 %v1115_v44, %v469_v46  ;;  %vm489_vm1 = vweird.f32 %v1115_v44 }
  0x89   : > { %v1119_v48 = vpop.eup %1118  ;;  %v493_v59 = vmul.f32 %v1117_v41, %v470_v16  ;;  %vm1700_vm3 = vmor %vm488_vm0, %vm489_vm1  ;;  %vm499_vm4 = vweird.f32 %v1117_v41 }
  0x8a   : > { %v1121_v43 = vpop.eup %1120  ;;  %v473_v60 = vmul.f32 %v1119_v48, %v468_v47  ;;  %v484_v62 = vmul.f32 %v1115_v44, %v483_v42  ;;  %vm479_vm6 = vweird.f32 %v1119_v48  ;;  %vm500_vm7 = vmor %vm498_vm2, %vm499_vm4 }
  0x8b   : > { %v494_v40 = vmul.f32 %v1117_v41, %v493_v59  ;;  %v503_v37 = vmul.f32 %v1121_v43, %v471_v13  ;;  %vm480_vm9 = vmor %vm478_vm5, %vm479_vm6  ;;  %vm509_vm10 = vweird.f32 %v1121_v43 }
  0x8c   : > { %v474_v38 = vmul.f32 %v1119_v48, %v473_v60  ;;  %v485_v63 = vmul.f32 0.5, %v484_v62  ;;  %vm510_vm11 = vmor %vm508_vm8, %vm509_vm10 }
  0x8d   : > { %v495_v1 = vmul.f32 0.5, %v494_v40  ;;  %v504_v39 = vmul.f32 %v1121_v43, %v503_v37 }
  0x8e   : > { %v475_v2 = vmul.f32 0.5, %v474_v38  ;;  %v486_v3 = vsub.f32 1.5, %v485_v63 }
  0x8f   : > { %v496_v36 = vsub.f32 1.5, %v495_v1  ;;  %v505_v7 = vmul.f32 0.5, %v504_v39 }
  0x90   : > { %v476_v33 = vsub.f32 1.5, %v475_v2  ;;  %v487_v34 = vmul.f32 %v1115_v44, %v486_v3 }
  0x91   : > { %v497_v35 = vmul.f32 %v1117_v41, %v496_v36  ;;  %v506_v32 = vsub.f32 1.5, %v505_v7 }
  0x92   : > { %v477_v0 = vmul.f32 %v1119_v48, %v476_v33  ;;  %v491_v61 = vsel %vm1700_vm3, %v1115_v44, %v487_v34 }
  0x93   : > { %v501_v29 = vsel %vm500_vm7, %v1117_v41, %v497_v35  ;;  %v516_v30 = vrot.slane %v491_v61, 7  ;;  %v507_v58 = vmul.f32 %v1121_v43, %v506_v32 }
  0x94   : > { %v481_v57 = vsel %vm480_vm9, %v1119_v48, %v477_v0  ;;  %v517_v31 = vrot.slane %v501_v29, 6 }
  0x95   : > { %v520_v56 = vsel %vm519_vm12, %v481_v57, %v516_v30  ;;  %v511_v28 = vsel %vm510_vm11, %v1121_v43, %v507_v58 }
  0x96   : > { %v518_v25 = vrot.slane %v511_v28, 5 }
  0x98   : > { %v522_v26 = vsel %vm521_vm13, %v517_v31, %v518_v25 }
  0x99   : > { %v524_v54 = vsel %vm523_vm14, %v520_v56, %v522_v26 }
  0x9a   : > { %530 = vst.msk [vmem:[#allocation2] sm:$0xf] %vm528_vm15, %v524_v54 }
  0xa1   : > { %v702_v6 = vld [vmem:[#allocation2] sm:$0xf] }
  0xa2   : > { %v704_v24 = vperm.slane %v702_v6, 0  ;;  %v705_v22 = vperm.slane %v702_v6, 1  ;;  %v706_v18 = vperm.slane %v702_v6, 2  ;;  %v707_v11 = vperm.slane %v702_v6, 3 }
  0xbb   : > { %v1711_v50 = vpop.permute.xlu0 %739  ;;  %v1759_v62 = vpop.permute.xlu1 %745 }
  0xbc   : > { %vm747_vm0 = vcmp.eq.s32.totalorder %v1707_v21, %v1711_v50  ;;  %vm748_vm1 = vcmp.eq.s32.totalorder %v1709_v49, %v1711_v50  ;;  %vm749_vm2 = vcmp.eq.s32.totalorder %v1729_v12, %v1711_v50  ;;  %vm750_vm3 = vcmp.eq.s32.totalorder %v1731_v45, %v1711_v50 }
  0xbd   : > { %vm755_vm6 = vcmp.eq.s32.totalorder %v1707_v21, %v1759_v62  ;;  %vm756_vm7 = vcmp.eq.s32.totalorder %v1709_v49, %v1759_v62  ;;  %vm757_vm10 = vcmp.eq.s32.totalorder %v1729_v12, %v1759_v62  ;;  %vm758_vm11 = vcmp.eq.s32.totalorder %v1731_v45, %v1759_v62 }
  0xc3   : > { %v615_v23 = vpop.f32.mrf.mxu0  ;;  %v641_v52 = vpop.f32.mrf.mxu1 }
  0xc4   : > { %v1713_v51 = vmul.f32 %v704_v24, %v615_v23  ;;  %v1717_v20 = vmul.f32 %v705_v22, %v641_v52  ;;  %v1739_v44 = vpop.permute.xlu0 %742 }
  0xc5   : > { %vm751_vm4 = vcmp.eq.s32.totalorder %v1707_v21, %v1739_v44  ;;  %vm752_vm5 = vcmp.eq.s32.totalorder %v1709_v49, %v1739_v44  ;;  %vm753_vm8 = vcmp.eq.s32.totalorder %v1729_v12, %v1739_v44  ;;  %vm754_vm9 = vcmp.eq.s32.totalorder %v1731_v45, %v1739_v44 }
  0xc6   : > { %v759_v17 = vsel %vm747_vm0, %v1713_v51, 0.0  ;;  %v760_v10 = vsel %vm748_vm1, %v1717_v20, 0.0 }
  0xc7   : > { %v771_v19 = vadd.f32 %v760_v10, %v759_v17 }
  0xca   : > { %v667_v14 = vpop.f32.mrf.mxu2  ;;  %v693_v15 = vpop.f32.mrf.mxu3 }
  0xcb   : > { %v1733_v46 = vmul.f32 %v706_v18, %v667_v14  ;;  %v1735_v16 = vmul.f32 %v707_v11, %v693_v15  ;;  %v618_v13 = vpop.f32.mrf.mxu0  ;;  %v644_v47 = vpop.f32.mrf.mxu1 }
  0xcc   : > { %v1745_v42 = vmul.f32 %v704_v24, %v618_v13  ;;  %v1747_v48 = vmul.f32 %v705_v22, %v644_v47 }
  0xcd   : > { %v761_v41 = vsel %vm749_vm2, %v1733_v46, 0.0  ;;  %v762_v43 = vsel %vm750_vm3, %v1735_v16, 0.0 }
  0xce   : > { %v772_v59 = vadd.f32 %v771_v19, %v761_v41  ;;  %v763_v40 = vsel %vm751_vm4, %v1745_v42, 0.0  ;;  %v764_v37 = vsel %vm752_vm5, %v1747_v48, 0.0 }
  0xcf   : > { %v776_v36 = vadd.f32 %v764_v37, %v763_v40 }
  0xd0   : > { %v773_v60 = vadd.f32 %v772_v59, %v762_v43 }
  0xd2   : > { %v670_v38 = vpop.f32.mrf.mxu2  ;;  %v696_v63 = vpop.f32.mrf.mxu3  ;;  %774 = vadd.xlane.f32.xlu1 %v773_v60 }
  0xd3   : > { %v1769_v1 = vmul.f32 %v706_v18, %v670_v38  ;;  %v1771_v39 = vmul.f32 %v707_v11, %v696_v63  ;;  %v621_v2 = vpop.f32.mrf.mxu0  ;;  %v647_v3 = vpop.f32.mrf.mxu1 }
  0xd4   : > { %v1779_v33 = vmul.f32 %v704_v24, %v621_v2  ;;  %v1781_v34 = vmul.f32 %v705_v22, %v647_v3 }
  0xd5   : > { %v765_v4 = vsel %vm753_vm8, %v1769_v1, 0.0  ;;  %v766_v35 = vsel %vm754_vm9, %v1771_v39, 0.0 }
  0xd6   : > { %v777_v7 = vadd.f32 %v776_v36, %v765_v4  ;;  %v767_v0 = vsel %vm755_vm6, %v1779_v33, 0.0  ;;  %v768_v61 = vsel %vm756_vm7, %v1781_v34, 0.0 }
  0xd7   : > { %v781_v57 = vadd.f32 %v768_v61, %v767_v0 }
  0xd8   : > { %v778_v32 = vadd.f32 %v777_v7, %v766_v35 }
  0xda   : > { %v673_v29 = vpop.f32.mrf.mxu2  ;;  %v699_v30 = vpop.f32.mrf.mxu3  ;;  %779 = vadd.xlane.f32.xlu2 %v778_v32 }
  0xdb   : > { %v1801_v58 = vmul.f32 %v706_v18, %v673_v29  ;;  %v1803_v31 = vmul.f32 %v707_v11, %v699_v30 }
  0xdd   : > { %v769_v56 = vsel %vm757_vm10, %v1801_v58, 0.0  ;;  %v770_v28 = vsel %vm758_vm11, %v1803_v31, 0.0 }
  0xde   : > { %v782_v53 = vadd.f32 %v781_v57, %v769_v56 }
  0xe0   : > { %v783_v25 = vadd.f32 %v782_v53, %v770_v28 }
  0xe2   : > { %784 = vadd.xlane.f32.xlu2 %v783_v25 }
 0x145   : > { %v775_v26 = vpop.xlane.xlu1 %774 }
 0x146   : > { %v786_v54 = vmul.f32 %v775_v26, %v775_v26  ;;  %v834_v2 = vmul.f32 0.87758255, %v775_v26  ;;  %v1033_v35 = vadd.f32 -0.23971277, %v775_v26  ;;  %vm843_vm14 = vcmp.gt.f32.partialorder %v775_v26, -0.87758255 }
 0x148   : > { %v789_v5 = vsub.f32 1.0, %v786_v54 }
 0x14a   : > { %v792_v27 = vmax.f32 %v789_v5, 0.0 }
 0x14c   : > { %v795_v6 = vmin.f32 %v792_v27, 1.0 }
 0x14d   : > { %v1817_v8 = vpop.xlane.xlu2 %779 }
 0x14e   : > { %1122 = vrsqrt.f32 %v795_v6  ;;  %v787_v24 = vmul.f32 %v1817_v8, %v1817_v8  ;;  %vm805_vm12 = vcmp.eq.f32.partialorder %v795_v6, inf  ;;  %v808_v60 = vand.u32 2147483648, %v795_v6 }
 0x14f   : > { %vm807_vm13 = vcmp.eq.f32.partialorder %v795_v6, 0.0  ;;  %v835_v27 = vmul.f32 0.87758255, %v1817_v8 }
 0x150   : > { %v790_v22 = vsub.f32 1.0, %v787_v24 }
 0x152   : > { %v793_v23 = vmax.f32 %v790_v22, 0.0 }
 0x154   : > { %v1123_v52 = vpop.eup %1122  ;;  %v796_v9 = vmin.f32 %v793_v23, 1.0  ;;  %v1034_v23 = vadd.f32 -0.23971277, %v1817_v8 }
 0x155   : > { %v799_v55 = vmul.f32 %v1123_v52, %v795_v6  ;;  %v1821_v17 = vpop.xlane.xlu2 %784 }
 0x156   : > { %v788_v10 = vmul.f32 %v1821_v17, %v1821_v17  ;;  %1124 = vrsqrt.f32 %v796_v9  ;;  %vm817_vm15 = vcmp.eq.f32.partialorder %v796_v9, inf  ;;  %v1035_v44 = vadd.f32 -0.23971277, %v1821_v17 }
 0x157   : > { %v800_v18 = vmul.f32 %v1123_v52, %v799_v55 }
 0x158   : > { %v791_v11 = vsub.f32 1.0, %v788_v10 }
 0x159   : > { %v801_v19 = vmul.f32 0.5, %v800_v18 }
 0x15a   : > { %v794_v14 = vmax.f32 %v791_v11, 0.0 }
 0x15b   : > { %v802_v15 = vsub.f32 1.5, %v801_v19 }
 0x15c   : > { %v1825_v13 = vmin.f32 %v794_v14, 1.0  ;;  %v1125_v47 = vpop.eup %1124 }
 0x15d   : > { %v803_v41 = vmul.f32 %v1123_v52, %v802_v15  ;;  %v811_v59 = vmul.f32 %v1125_v47, %v796_v9 }
 0x15e   : > { %1126 = vrsqrt.f32 %v1825_v13  ;;  %v832_v10 = vand.u32 2147483648, %v1825_v13 }
 0x15f   : > { %v804_v43 = vmul.f32 %v803_v41, %v795_v6  ;;  %v812_v40 = vmul.f32 %v1125_v47, %v811_v59 }
 0x161   : > { %v806_v37 = vsel %vm805_vm12, %v795_v6, %v804_v43  ;;  %v813_v63 = vmul.f32 0.5, %v812_v40 }
 0x162   : > { %v809_v38 = vsel %vm807_vm13, %v808_v60, %v806_v37 }
 0x163   : > { %v837_v3 = vmul.f32 0.47942555, %v809_v38  ;;  %v814_v4 = vsub.f32 1.5, %v813_v63 }
 0x164   : > { %v1127_v36 = vpop.eup %1126 }
 0x165   : > { %v840_v7 = vsub.f32 %v834_v2, %v837_v3  ;;  %v823_v0 = vmul.f32 %v1127_v36, %v1825_v13  ;;  %v815_v61 = vmul.f32 %v1125_v47, %v814_v4 }
 0x167   : > { %v849_v32 = vsel %vm843_vm14, %v840_v7, %v1033_v35  ;;  %v824_v29 = vmul.f32 %v1127_v36, %v823_v0 }
 0x168   : > { %v852_v30 = vsel %vm747_vm0, %v849_v32, %v1713_v51  ;;  %v853_v57 = vsel %vm748_vm1, %v849_v32, %v1717_v20  ;;  %v854_v56 = vsel %vm749_vm2, %v849_v32, %v1733_v46  ;;  %v855_v53 = vsel %vm750_vm3, %v849_v32, %v1735_v16 }
 0x169   : > { %v864_v28 = vmul.f32 64.0, %v852_v30  ;;  %v865_v25 = vmul.f32 64.0, %v853_v57  ;;  %v866_v26 = vmul.f32 64.0, %v854_v56  ;;  %v867_v54 = vmul.f32 64.0, %v855_v53 }
 0x16a   : > { %v816_v51 = vmul.f32 %v815_v61, %v796_v9  ;;  %v825_v5 = vmul.f32 0.5, %v824_v29  ;;  %v820_v20 = vand.u32 2147483648, %v796_v9  ;;  %vm819_vm0 = vcmp.eq.f32.partialorder %v796_v9, 0.0 }
 0x16b   : > { %876 = vst [vmem:[%s1846_s29] sm:$0xff] %v864_v28  ;;  %vm844_vm1 = vcmp.gt.f32.partialorder %v1817_v8, -0.87758255  ;;  %vm829_vm2 = vcmp.eq.f32.partialorder %v1825_v13, inf  ;;  %vm831_vm3 = vcmp.eq.f32.partialorder %v1825_v13, 0.0 }
 0x16c   : > { %877 = vst [vmem:[%s1846_s29 + $0x8] sm:$0xff] %v865_v25  ;;  %v818_v46 = vsel %vm817_vm15, %v796_v9, %v816_v51  ;;  %v826_v50 = vsub.f32 1.5, %v825_v5 }
 0x16d   : > { %878 = vst [vmem:[%s1846_s29 + $0x10] sm:$0xff] %v866_v26  ;;  %v821_v16 = vsel %vm819_vm0, %v820_v20, %v818_v46 }
 0x16e   : > { %879 = vst [vmem:[%s1846_s29 + $0x18] sm:$0xff] %v867_v54  ;;  %v838_v6 = vmul.f32 0.47942555, %v821_v16  ;;  %v827_v24 = vmul.f32 %v1127_v36, %v826_v50 }
 0x170   : > { %v841_v22 = vsub.f32 %v835_v27, %v838_v6  ;;  %v828_v52 = vmul.f32 %v827_v24, %v1825_v13 }
 0x172   : > { %v850_v55 = vsel %vm844_vm1, %v841_v22, %v1034_v23  ;;  %v830_v9 = vsel %vm829_vm2, %v1825_v13, %v828_v52 }
 0x173   : > { %v856_v18 = vsel %vm751_vm4, %v850_v55, %v1745_v42  ;;  %v857_v8 = vsel %vm752_vm5, %v850_v55, %v1747_v48  ;;  %v858_v11 = vsel %vm753_vm8, %v850_v55, %v1769_v1  ;;  %v859_v19 = vsel %vm754_vm9, %v850_v55, %v1771_v39 }
 0x174   : > { %v868_v14 = vmul.f32 64.0, %v856_v18  ;;  %v869_v15 = vmul.f32 64.0, %v857_v8  ;;  %v870_v47 = vmul.f32 64.0, %v858_v11  ;;  %v871_v42 = vmul.f32 64.0, %v859_v19 }
 0x175   : > { %v833_v41 = vsel %vm831_vm3, %v832_v10, %v830_v9  ;;  %v836_v48 = vmul.f32 0.87758255, %v1821_v17  ;;  %vm845_vm4 = vcmp.gt.f32.partialorder %v1821_v17, -0.87758255 }
 0x176   : > { %880 = vst [vmem:[%s1846_s29 + $0x20] sm:$0xff] %v868_v14  ;;  %v839_v59 = vmul.f32 0.47942555, %v833_v41 }
 0x177   : > { %881 = vst [vmem:[%s1846_s29 + $0x28] sm:$0xff] %v869_v15 }
 0x178   : > { %882 = vst [vmem:[%s1846_s29 + $0x30] sm:$0xff] %v870_v47  ;;  %v842_v1 = vsub.f32 %v836_v48, %v839_v59 }
 0x179   : > { %883 = vst [vmem:[%s1846_s29 + $0x38] sm:$0xff] %v871_v42 }
 0x17a   : > { %v851_v39 = vsel %vm845_vm4, %v842_v1, %v1035_v44 }
 0x17b   : > { %v860_v13 = vsel %vm755_vm6, %v851_v39, %v1779_v33  ;;  %v861_v43 = vsel %vm756_vm7, %v851_v39, %v1781_v34  ;;  %v862_v17 = vsel %vm757_vm10, %v851_v39, %v1801_v58  ;;  %v863_v60 = vsel %vm758_vm11, %v851_v39, %v1803_v31 }
 0x17c   : > { %v872_v21 = vmul.f32 64.0, %v860_v13  ;;  %v873_v40 = vmul.f32 64.0, %v861_v43  ;;  %v874_v33 = vmul.f32 64.0, %v862_v17  ;;  %v875_v37 = vmul.f32 64.0, %v863_v60 }
 0x17e   : > { %884 = vst [vmem:[%s1846_s29 + $0x40] sm:$0xff] %v872_v21 }
 0x17f   : > { %885 = vst [vmem:[%s1846_s29 + $0x48] sm:$0xff] %v873_v40 }
 0x180   : > { %886 = vst [vmem:[%s1846_s29 + $0x50] sm:$0xff] %v874_v33 }
 0x181   : > { %887 = vst [vmem:[%s1846_s29 + $0x58] sm:$0xff] %v875_v37 }
 0x182   : > { %1185 = shalt.err (!%p1182_p13)
}
 0x183   : > { %s1246_s21 = smov 512   ;;  %s1247_s19 = smov 1024  }
 0x184   : > { %s1248_s23 = smov 32  }
 0x185   : > { %1045 = dma.vmem_to_hbm [thread:$0]  (%p1320_p9), %s905_s15, 1536, %s907_s4, %s889_s5, %s1246_s21, %s1247_s19, %s1248_s23  }
 0x186 PF: > { %s921_s29 = sand.u32 1, %s1220_s12   ;;  %p1052_p0 = pnand %p1026_p12, %p1327_p11 }
 0x187   : > { %s922_s30 = scalar_lea.sflag [#allocation5], %s921_s29 }
 0x188   : > { %p1053_p1 = pneg %p1052_p0 }
 0x18a   : > { %1215 = dma.done.wait (%p1053_p1), %s922_s30, 1536  }
 0x18b   : > { %1217 = vsyncadd (%p1053_p1), %s922_s30, 4294965760  ;;  %s19_s17 = sadd.s32 1, %s1240_s17   ;;  %s2000_s12 = smov %s1224_s13 }
 0x18c   : > { %p16_p2 = scmp.ge.s32.totalorder %s19_s17, 4   ;;  %s2001_s13 = smov %s1228_s14 }
 0x18d   : > { %s2002_s14 = smov %s1325_s26  ;;  %s2003_s15 = smov %s1236_s16 }
 0x18e   : > { %s2004_s16 = smov %s2006_s20  ;;  %18 = sbr.rel (!%p16_p2) target bundleno = 6 (0x6), region = 87 }
 0x193   :  { %928 = vsyncpa [#allocation4], 1 }
 0x194   :  { %930 = vsyncpa [#allocation4 + $0x1], 1 }
 0x195   :  { %931 = vsyncpa [#allocation5], 1 }
 0x196   :  { %933 = vsyncpa [#allocation5 + $0x1], 1 }

</bundles_post_ra>
